<compile_context>
chip_gen: v5e
topology: v5e:2x2
jax: 0.10.0
libtpu: 0.0.40
codegen_flags: <defaults>
</compile_context>

<pallas_src>
import functools

import jax
import jax.numpy as jnp
from jax import lax
from jax.experimental import pallas as pl
from jax.experimental.pallas import tpu as pltpu


def _round_down_mult(v, m):
    return (v // m) * m


# ------------------------------ Pallas kernel -------------------------------

def _mbstd_kernel(x_ref, o_ref, acc_ref, *, C, tc_out, sub, n_sub, nx, eps,
                  inv_count):
    """One grid step.

    x_ref   : (G, TM, Cin_blk,  HW)  input channel tile (original dtype)
    o_ref   : (G, TM, Cout_blk, HW)  output channel tile
    acc_ref : (TM, HW) f32           running per-m sum of std over channels
    """
    G, TM, cin, HW = x_ref.shape
    ct = pl.program_id(1)
    last = pl.num_programs(1) - 1
    c0 = ct * tc_out                                  # global channel offset of this tile

    @pl.when(ct == 0)
    def _init():
        acc_ref[...] = jnp.zeros_like(acc_ref)

    def chunk(lo, sz):
        """Copy x[ch lo:lo+sz] straight through; return its masked std sum."""
        xs = x_ref[:, :, pl.ds(lo, sz), :]            # (G, TM, sz, HW), orig dtype
        o_ref[:, :, pl.ds(lo, sz), :] = xs            # sliced passthrough store (no concat)
        xf = xs.astype(jnp.float32)                   # upcast only this chunk
        mu = jnp.mean(xf, axis=0, keepdims=True)      # (1, TM, sz, HW)
        var = jnp.mean((xf - mu) ** 2, axis=0)        # (TM, sz, HW) biased group var
        std = jnp.sqrt(var + eps)
        ch = lax.broadcasted_iota(jnp.int32, std.shape, 1) + (c0 + lo)
        std = jnp.where(ch < C, std, 0.0)             # mask block-edge padding channels
        return jnp.sum(std, axis=1)                   # (TM, HW)

    @pl.when(c0 < C)                                  # skip the stat-only extra tile
    def _accumulate():
        if n_sub == 1:
            part = chunk(0, cin)
        else:
            def body(s, carry):
                lo = pl.multiple_of(s * sub, 8)
                return carry + chunk(lo, sub)
            part = lax.fori_loop(0, n_sub, body,
                                 jnp.zeros((TM, HW), jnp.float32), unroll=True)
        acc_ref[...] += part

    @pl.when(ct == last)                              # last tile always holds channel C
    def _finalize():
        # sum-then-divide by the true C*H*W count (not mean of per-tile means)
        stat = jnp.sum(acc_ref[...], axis=1, keepdims=True) * inv_count   # (TM, 1)
        stat_b = jnp.broadcast_to(
            stat.reshape(1, TM, 1, 1).astype(o_ref.dtype), (G, TM, 1, HW))
        o_ref[:, :, nx:nx + 1, :] = stat_b            # stat channel = global channel C


# --------------------------------- wrapper ----------------------------------

def minibatch_stddev(x, group_size=4, eps=1e-4, *,
                     small_bytes=2 << 20,       # whole problem in one grid step below this
                     tile_bytes=1 << 20,        # target bytes per input channel-tile block
                     sub_chunk_bytes=64 << 10): # f32 working set per in-kernel sub-chunk
    """Pallas implementation of MiniBatchStdDev.forward. x: (B, C, H, W)."""
    B, C, H, W = x.shape
    G = group_size if B % group_size == 0 else B
    M = B // G
    HW = H * W
    isz = x.dtype.itemsize
    xr = x.reshape(G, M, C, HW)            # free reshape: b = g*M + m ; lane-dense HW

    total_bytes = G * M * C * HW * isz
    if total_bytes <= small_bytes:
        # Single grid step: one contiguous DMA in/out, per-m stats vectorized over M.
        TM, n_mt = M, 1
        cin, cout, tc_out, n_ct = C, C + 1, C + 1, 1
    elif C >= 8:
        # grid = (M, channel tiles): "parallel" x "arbitrary" with Σstd accumulator.
        TM, n_mt = 1, M
        per_ch = G * HW * isz
        tc = max(8, min(_round_down_mult(C, 8),
                        _round_down_mult(max(tile_bytes // per_ch, 1), 8)))
        cin, cout, tc_out = tc, tc, tc
        n_ct = C // tc + 1                 # last tile holds channel C (stat channel)
    else:
        # Tiny channel count: per-m blocks with the full channel extent.
        # TODO(synk): also tile the HW (lane) axis for extremely large H*W.
        TM, n_mt = 1, M
        cin, cout, tc_out, n_ct = C, C + 1, C + 1, 1

    n_in_ct = max(1, pl.cdiv(C, cin))      # number of real input channel blocks
    nx = C - (n_ct - 1) * tc_out           # x-channels left in the last tile (may be 0)

    # In-kernel sub-chunking (bounds vreg liveness) -- only for 8-aligned tiles.
    if n_ct > 1:
        sub = max(8, min(cin, _round_down_mult(
            max(sub_chunk_bytes // (G * TM * HW * 4), 1), 8)))
        while cin % sub:
            sub -= 8
        n_sub = cin // sub
    else:
        sub, n_sub = cin, 1

    kernel = functools.partial(
        _mbstd_kernel, C=C, tc_out=tc_out, sub=sub, n_sub=n_sub, nx=nx,
        eps=float(eps), inv_count=1.0 / float(C * HW))

    out = pl.pallas_call(
        kernel,
        out_shape=jax.ShapeDtypeStruct((G, M, C + 1, HW), x.dtype),
        grid_spec=pltpu.PrefetchScalarGridSpec(
            num_scalar_prefetch=0,
            grid=(n_mt, n_ct),
            in_specs=[pl.BlockSpec(
                (G, TM, cin, HW),
                # clamp: the stat-only last tile (C % tc == 0) re-uses the previous
                # input block index -> Pallas skips the redundant DMA.
                lambda mt, ct: (0, mt, jnp.minimum(ct, n_in_ct - 1), 0))],
            out_specs=pl.BlockSpec(
                (G, TM, cout, HW), lambda mt, ct: (0, mt, ct, 0)),
            scratch_shapes=[pltpu.VMEM((TM, HW), jnp.float32)]),
        compiler_params=pltpu.CompilerParams(
            dimension_semantics=("parallel", "arbitrary"),
            vmem_limit_bytes=32 * 1024 * 1024),
    )(xr)

    return out.reshape(B, C + 1, H, W)


# --------------------------- pure-JAX reference -----------------------------

def ref_minibatch_stddev(x, group_size=4, eps=1e-4):
    B, C, H, W = x.shape
    G = group_size if B % group_size == 0 else B
    M = B // G
    y = x.reshape(G, M, C, H, W)
    y = y - y.mean(axis=0, keepdims=True)
    y = (y ** 2).mean(axis=0)                  # (M, C, H, W)
    y = jnp.sqrt(y + eps)
    y = y.mean(axis=(1, 2, 3), keepdims=True)  # (M, 1, 1, 1)
    y = jnp.tile(y, (G, 1, H, W))              # (B, 1, H, W): out[b] = y[b % M]
    return jnp.concatenate([x, y], axis=1)     # (B, C+1, H, W)


# ----------------------------------- main ------------------------------------

if __name__ == "__main__":
    key = jax.random.PRNGKey(0)
    k1, k2, k3, k4 = jax.random.split(key, 4)

    def run_and_check(x, group_size=4, **kw):
        out = jax.block_until_ready(minibatch_stddev(x, group_size=group_size, **kw))
        ref = ref_minibatch_stddev(x, group_size=group_size)
        assert out.shape == ref.shape, (out.shape, ref.shape)
        assert jnp.allclose(out, ref, atol=1e-5, rtol=1e-5), \
            float(jnp.max(jnp.abs(out - ref)))

    # 1) small path, B % group_size == 0 (G=4, M=2): single grid step, one DMA.
    run_and_check(jax.random.normal(k1, (8, 4, 16, 16), jnp.float32))

    # 2) small path, B % group_size != 0 (groups = B, M = 1 fallback).
    run_and_check(jax.random.normal(k2, (6, 4, 16, 16), jnp.float32))

    # 3) forced channel-tiled path: ragged last tile + in-kernel sub-chunk loop.
    run_and_check(jax.random.normal(k3, (8, 20, 16, 16), jnp.float32),
                  small_bytes=0, tile_bytes=64 * 1024, sub_chunk_bytes=32 * 1024)

    # 4) forced channel-tiled path with C % Tc == 0 (stat-only last tile, clamped DMA).
    run_and_check(jax.random.normal(k4, (8, 32, 16, 16), jnp.float32),
                  small_bytes=0, tile_bytes=64 * 1024, sub_chunk_bytes=32 * 1024)

    print("KERNEL_OK")
</pallas_src>

<mosaic_0001>
module attributes {stable_mosaic.version = 11 : i64} {
  func.func @_mbstd_kernel(%arg0: i32, %arg1: i32, %arg2: memref<4x2x4x256xf32, #tpu.memory_space<vmem>>, %arg3: memref<4x2x5x256xf32, #tpu.memory_space<vmem>>, %arg4: memref<2x256xf32, #tpu.memory_space<vmem>>) attributes {dimension_semantics = [#tpu.dimension_semantics<parallel>, #tpu.dimension_semantics<arbitrary>], iteration_bounds = array<i64: 1, 1>, scalar_prefetch = 0 : i64, scratch_operands = 1 : i64, tpu.core_type = #tpu.core_type<tc>, window_params = [{transform_indices = @transform_0, window_bounds = array<i64: 4, 2, 4, 256>}, {transform_indices = @transform_1, window_bounds = array<i64: 4, 2, 5, 256>}]} {
    %c5_i32 = arith.constant 5 : i32
    %0 = arith.muli %arg1, %c5_i32 : i32
    %c0_i32 = arith.constant 0 : i32
    %1 = arith.cmpi eq, %arg1, %c0_i32 : i32
    %2 = arith.extui %1 : i1 to i32
    %c0_i32_0 = arith.constant 0 : i32
    %3 = arith.cmpi ne, %2, %c0_i32_0 : i32
    scf.if %3 {
      %cst = arith.constant 0.000000e+00 : f32
      %10 = vector.broadcast %cst : f32 to vector<2x256xf32>
      %c0 = arith.constant 0 : index
      %c0_4 = arith.constant 0 : index
      %11 = vector.load %arg4[%c0, %c0_4] : memref<2x256xf32, #tpu.memory_space<vmem>>, vector<2x256xf32>
      tpu.vector_store %arg4[%c0, %c0_4], %10 {strides = array<i32>} : memref<2x256xf32, #tpu.memory_space<vmem>>, vector<2x256xf32>,
    } else {
    }
    %c4_i32 = arith.constant 4 : i32
    %4 = arith.cmpi slt, %0, %c4_i32 : i32
    %5 = arith.extui %4 : i1 to i32
    %c0_i32_1 = arith.constant 0 : i32
    %6 = arith.cmpi ne, %5, %c0_i32_1 : i32
    scf.if %6 {
      %c0 = arith.constant 0 : index
      %c0_4 = arith.constant 0 : index
      %c0_5 = arith.constant 0 : index
      %c0_6 = arith.constant 0 : index
      %10 = vector.load %arg2[%c0, %c0_4, %c0_5, %c0_6] : memref<4x2x4x256xf32, #tpu.memory_space<vmem>>, vector<4x2x4x256xf32>
      %c0_7 = arith.constant 0 : index
      %c0_8 = arith.constant 0 : index
      %c0_9 = arith.constant 0 : index
      %c0_10 = arith.constant 0 : index
      %11 = vector.load %arg3[%c0_7, %c0_8, %c0_9, %c0_10] : memref<4x2x5x256xf32, #tpu.memory_space<vmem>>, vector<4x2x4x256xf32>
      tpu.vector_store %arg3[%c0_7, %c0_8, %c0_9, %c0_10], %10 {strides = array<i32>} : memref<4x2x5x256xf32, #tpu.memory_space<vmem>>, vector<4x2x4x256xf32>,
      %cst = arith.constant dense<0.000000e+00> : vector<2x4x256xf32>
      %12 = vector.multi_reduction <add>, %10, %cst [0] : vector<4x2x4x256xf32> to vector<2x4x256xf32>
      %13 = vector.shape_cast %12 : vector<2x4x256xf32> to vector<1x2x4x256xf32>
      %cst_11 = arith.constant 4.000000e+00 : f32
      %14 = vector.broadcast %cst_11 : f32 to vector<1x2x4x256xf32>
      %15 = arith.divf %13, %14 : vector<1x2x4x256xf32>
      %16 = vector.broadcast %15 : vector<1x2x4x256xf32> to vector<4x2x4x256xf32>
      %17 = arith.subf %10, %16 : vector<4x2x4x256xf32>
      %18 = arith.mulf %17, %17 : vector<4x2x4x256xf32>
      %cst_12 = arith.constant dense<0.000000e+00> : vector<2x4x256xf32>
      %19 = vector.multi_reduction <add>, %18, %cst_12 [0] : vector<4x2x4x256xf32> to vector<2x4x256xf32>
      %cst_13 = arith.constant 4.000000e+00 : f32
      %20 = vector.broadcast %cst_13 : f32 to vector<2x4x256xf32>
      %21 = arith.divf %19, %20 : vector<2x4x256xf32>
      %cst_14 = arith.constant 9.99999974E-5 : f32
      %22 = vector.broadcast %cst_14 : f32 to vector<2x4x256xf32>
      %23 = arith.addf %21, %22 : vector<2x4x256xf32>
      %24 = math.sqrt %23 : vector<2x4x256xf32>
      %25 = tpu.iota {dimensions = array<i32: 1>} : vector<2x4x256xi32>
      %c0_i32_15 = arith.constant 0 : i32
      %26 = arith.addi %0, %c0_i32_15 : i32
      %27 = vector.broadcast %26 : i32 to vector<2x4x256xi32>
      %28 = arith.addi %25, %27 : vector<2x4x256xi32>
      %c4_i32_16 = arith.constant 4 : i32
      %29 = vector.broadcast %c4_i32_16 : i32 to vector<2x4x256xi32>
      %30 = arith.cmpi slt, %28, %29 : vector<2x4x256xi32>
      %cst_17 = arith.constant 0.000000e+00 : f32
      %31 = vector.broadcast %cst_17 : f32 to vector<2x4x256xf32>
      %32 = arith.select %30, %24, %31 : vector<2x4x256xi1>, vector<2x4x256xf32>
      %cst_18 = arith.constant dense<0.000000e+00> : vector<2x256xf32>
      %33 = vector.multi_reduction <add>, %32, %cst_18 [1] : vector<2x4x256xf32> to vector<2x256xf32>
      %c0_19 = arith.constant 0 : index
      %c0_20 = arith.constant 0 : index
      %34 = vector.load %arg4[%c0_19, %c0_20] : memref<2x256xf32, #tpu.memory_space<vmem>>, vector<2x256xf32>
      %35 = arith.addf %34, %33 : vector<2x256xf32>
      %c0_21 = arith.constant 0 : index
      %c0_22 = arith.constant 0 : index
      %36 = vector.load %arg4[%c0_21, %c0_22] : memref<2x256xf32, #tpu.memory_space<vmem>>, vector<2x256xf32>
      tpu.vector_store %arg4[%c0_21, %c0_22], %35 {strides = array<i32>} : memref<2x256xf32, #tpu.memory_space<vmem>>, vector<2x256xf32>,
    } else {
    }
    %c0_i32_2 = arith.constant 0 : i32
    %7 = arith.cmpi eq, %arg1, %c0_i32_2 : i32
    %8 = arith.extui %7 : i1 to i32
    %c0_i32_3 = arith.constant 0 : i32
    %9 = arith.cmpi ne, %8, %c0_i32_3 : i32
    scf.if %9 {
      %c0 = arith.constant 0 : index
      %c0_4 = arith.constant 0 : index
      %10 = vector.load %arg4[%c0, %c0_4] : memref<2x256xf32, #tpu.memory_space<vmem>>, vector<2x256xf32>
      %cst = arith.constant dense<0.000000e+00> : vector<2xf32>
      %11 = vector.multi_reduction <add>, %10, %cst [1] : vector<2x256xf32> to vector<2xf32>
      %12 = vector.shape_cast %11 : vector<2xf32> to vector<2x1xf32>
      %cst_5 = arith.constant 9.765625E-4 : f32
      %13 = vector.broadcast %cst_5 : f32 to vector<2x1xf32>
      %14 = arith.mulf %12, %13 : vector<2x1xf32>
      %15 = vector.shape_cast %14 : vector<2x1xf32> to vector<1x2x1x1xf32>
      %16 = vector.shape_cast %15 : vector<1x2x1x1xf32> to vector<1x2x1x1xf32>
      %17 = vector.broadcast %16 : vector<1x2x1x1xf32> to vector<4x2x1x256xf32>
      %c0_6 = arith.constant 0 : index
      %c0_7 = arith.constant 0 : index
      %c4 = arith.constant 4 : index
      %c0_8 = arith.constant 0 : index
      %18 = vector.load %arg3[%c0_6, %c0_7, %c4, %c0_8] : memref<4x2x5x256xf32, #tpu.memory_space<vmem>>, vector<4x2x1x256xf32>
      tpu.vector_store %arg3[%c0_6, %c0_7, %c4, %c0_8], %17 {strides = array<i32>} : memref<4x2x5x256xf32, #tpu.memory_space<vmem>>, vector<4x2x1x256xf32>,
    } else {
    }
    return
  }
  func.func @transform_0(%arg0: i32, %arg1: i32) -> (i32, i32, i32, i32) {
    %c0_i32 = arith.constant 0 : i32
    %0 = arith.minsi %arg1, %c0_i32 : i32
    %c0_i32_0 = arith.constant 0 : i32
    %c0_i32_1 = arith.constant 0 : i32
    %c0_i32_2 = arith.constant 0 : i32
    return %c0_i32_0, %arg0, %0, %c0_i32_1 : i32, i32, i32, i32
  }
  func.func @transform_1(%arg0: i32, %arg1: i32) -> (i32, i32, i32, i32) {
    %c0_i32 = arith.constant 0 : i32
    %c0_i32_0 = arith.constant 0 : i32
    %c0_i32_1 = arith.constant 0 : i32
    return %c0_i32, %arg0, %arg1, %c0_i32_0 : i32, i32, i32, i32
  }
}

</mosaic_0001>

<bundles_post_ra>
// kernel: tpu_custom_call.1
= control target key start
LH: loop header
LB: loop body
LE: loop exit
PB: predicated region body
PF: predicated region fallthrough
CT: control target
= control target key end

     0   :  { %6 = vsyncpa [#allocation4], 0  ;;  %s520_s9 = smov [#allocation3]   ;;  %s521_s11 = smov 128   ;;  %s713_s0 = inlined_call_operand.hbm [shape: f32[4,2,4,256], index: 0, kind: input, shape index: {}]   ;;  %s714_s1 = inlined_call_operand.vmem [shape: f32[4,2,5,256], index: 1, kind: output, shape index: {}]  }
   0x1   :  { %s11_s8 = sshll.u32 %s713_s0, 4  ;;  %s13_s10 = sshll.u32 %s520_s9, 4  ;;  %s12_s8 = int_to_ptr.hbm [resolvable:$true] %s11_s8  ;;  %s14_s10 = int_to_ptr.vmem [resolvable:$true] %s13_s10 }
   0x2   :  { %s522_s12 = smov 8  }
   0x3   :  { %19 = dma.hbm_to_vmem [thread:$0]  %s12_s8, 1024, %s14_s10, [#allocation4], %s521_s11, %s521_s11, %s522_s12  }
   0x4   :  { %518 = dma.done.wait [#allocation4], 1024  }
   0x5   :  { %519 = vsyncadd [#allocation4], 4294966272  ;;  %v523_v0 = vmov 0.0   ;;  %v538_v1 = vld [vmem:[#allocation3] sm:$0xff]  ;;  %v540_v2 = vld [vmem:[#allocation3 + $0x8] sm:$0xff]  ;;  %v524_v25 = vmov 4.0  }
   0x6   :  { %29 = vst [vmem:[#allocation2] sm:$0xf] %v523_v0  ;;  %v542_v3 = vld [vmem:[#allocation3 + $0x10] sm:$0xff]  ;;  %v544_v4 = vld [vmem:[#allocation3 + $0x18] sm:$0xff]  ;;  %v550_v5 = vld [vmem:[#allocation3 + $0x20] sm:$0xff]  ;;  %484 = vrcp.f32 %v524_v25  ;;  %vm152_vm0 = vcmask 1043456  }
   0x7   :  { %50 = vst [vmem:[#allocation1] ss:$2 sm:$0xff] %v538_v1  ;;  %v552_v6 = vld [vmem:[#allocation3 + $0x28] sm:$0xff]  ;;  %v554_v8 = vld [vmem:[#allocation3 + $0x30] sm:$0xff]  ;;  %v556_v15 = vld [vmem:[#allocation3 + $0x38] sm:$0xff]  ;;  %vm397_vm11 = vcmask 1041408  }
   0x8   :  { %54 = vst [vmem:[#allocation1 + $0x10] ss:$2 sm:$0xff] %v540_v2  ;;  %vm405_vm12 = vcmask 1041409   ;;  %vm407_vm13 = vcmask 1043459   ;;  %vm409_vm14 = vcmask 1045509   ;;  %vm411_vm15 = vcmask 1047559  }
   0x9   :  { %58 = vst [vmem:[#allocation1 + $0x20] ss:$2 sm:$0xff] %v542_v3 }
   0xa   :  { %62 = vst [vmem:[#allocation1 + $0x30] ss:$2 sm:$0xff] %v544_v4 }
   0xc   :  { %v485_v26 = vpop.eup %484 }
   0xd   :  { %v182_v28 = vmul.f32 4.0, %v485_v26  ;;  %vm186_vm1 = vweird.f32 %v485_v26 }
   0xe   :  { %v51_v7 = vld.sshfl [vmem:[#allocation1] sm:$0xff pattern:$0x75316420]  ;;  %v52_v9 = vld.sshfl [vmem:[#allocation1 + $0x8] sm:$0xff pattern:$0x75316420] }
   0xf   :  { %v55_v10 = vld.sshfl [vmem:[#allocation1 + $0x10] sm:$0xff pattern:$0x75316420]  ;;  %v56_v11 = vld.sshfl [vmem:[#allocation1 + $0x18] sm:$0xff pattern:$0x75316420] }
  0x10   :  { %v59_v12 = vld.sshfl [vmem:[#allocation1 + $0x20] sm:$0xff pattern:$0x75316420]  ;;  %v60_v13 = vld.sshfl [vmem:[#allocation1 + $0x28] sm:$0xff pattern:$0x75316420] }
  0x11   :  { %v63_v14 = vld.sshfl [vmem:[#allocation1 + $0x30] sm:$0xff pattern:$0x75316420]  ;;  %v64_v16 = vld.sshfl [vmem:[#allocation1 + $0x38] sm:$0xff pattern:$0x75316420] }
  0x12   :  { %65 = vst [vmem:[#allocation1] ss:$2 sm:$0xff] %v550_v5  ;;  %v183_v36 = vsub.f32 1.0, %v182_v28 }
  0x13   :  { %68 = vst [vmem:[#allocation1 + $0x10] ss:$2 sm:$0xff] %v552_v6 }
  0x14   :  { %71 = vst [vmem:[#allocation1 + $0x20] ss:$2 sm:$0xff] %v554_v8  ;;  %v184_v37 = vmul.f32 %v485_v26, %v183_v36 }
  0x15   :  { %74 = vst [vmem:[#allocation1 + $0x30] ss:$2 sm:$0xff] %v556_v15 }
  0x16   :  { %93 = vst [vmem:[%s714_s1] sm:$0xf] %v51_v7  ;;  %v185_v58 = vadd.f32 %v485_v26, %v184_v37 }
  0x17   :  { %94 = vst [vmem:[%s714_s1 + $0x8] sm:$0xf] %v52_v9 }
  0x18   :  { %95 = vst [vmem:[%s714_s1 + $0x10] sm:$0xf] %v55_v10 }
  0x19   :  { %96 = vst [vmem:[%s714_s1 + $0x18] sm:$0xf] %v56_v11  ;;  %v66_v17 = vld.sshfl [vmem:[#allocation1] sm:$0xff pattern:$0x75316420] }
  0x1a   :  { %97 = vst [vmem:[%s714_s1 + $0x20] sm:$0xf] %v59_v12  ;;  %v67_v18 = vld.sshfl [vmem:[#allocation1 + $0x8] sm:$0xff pattern:$0x75316420] }
  0x1b   :  { %98 = vst [vmem:[%s714_s1 + $0x28] sm:$0xf] %v60_v13  ;;  %v69_v19 = vld.sshfl [vmem:[#allocation1 + $0x10] sm:$0xff pattern:$0x75316420] }
  0x1c   :  { %99 = vst [vmem:[%s714_s1 + $0x30] sm:$0xf] %v63_v14  ;;  %v70_v20 = vld.sshfl [vmem:[#allocation1 + $0x18] sm:$0xff pattern:$0x75316420] }
  0x1d   :  { %100 = vst [vmem:[%s714_s1 + $0x38] sm:$0xf] %v64_v16  ;;  %v72_v21 = vld.sshfl [vmem:[#allocation1 + $0x20] sm:$0xff pattern:$0x75316420] }
  0x1e   :  { %101 = vst [vmem:[%s714_s1 + $0x40] sm:$0xf] %v66_v17  ;;  %v73_v22 = vld.sshfl [vmem:[#allocation1 + $0x28] sm:$0xff pattern:$0x75316420] }
  0x1f   :  { %102 = vst [vmem:[%s714_s1 + $0x48] sm:$0xf] %v67_v18  ;;  %v75_v23 = vld.sshfl [vmem:[#allocation1 + $0x30] sm:$0xff pattern:$0x75316420]  ;;  %v635_v18 = vsel %vm186_vm1, %v485_v26, %v185_v58 }
  0x20   :  { %103 = vst [vmem:[%s714_s1 + $0x50] sm:$0xf] %v69_v19  ;;  %v76_v24 = vld.sshfl [vmem:[#allocation1 + $0x38] sm:$0xff pattern:$0x75316420] }
  0x21   :  { %104 = vst [vmem:[%s714_s1 + $0x58] sm:$0xf] %v70_v20 }
  0x22   :  { %105 = vst [vmem:[%s714_s1 + $0x60] sm:$0xf] %v72_v21 }
  0x23   :  { %106 = vst [vmem:[%s714_s1 + $0x68] sm:$0xf] %v73_v22 }
  0x24   :  { %107 = vst [vmem:[%s714_s1 + $0x70] sm:$0xf] %v75_v23 }
  0x25   :  { %108 = vst [vmem:[%s714_s1 + $0x78] sm:$0xf] %v76_v24 }
  0x26   :  { %109 = vst [vmem:[#allocation1] ss:$2 sm:$0xff] %v538_v1 }
  0x27   :  { %113 = vst [vmem:[#allocation1 + $0x10] ss:$2 sm:$0xff] %v540_v2 }
  0x28   :  { %117 = vst [vmem:[#allocation1 + $0x20] ss:$2 sm:$0xff] %v542_v3 }
  0x29   :  { %121 = vst [vmem:[#allocation1 + $0x30] ss:$2 sm:$0xff] %v544_v4 }
  0x2d   :  { %v110_v27 = vld.sshfl [vmem:[#allocation1] sm:$0xff pattern:$0x75316420]  ;;  %v111_v29 = vld.sshfl [vmem:[#allocation1 + $0x8] sm:$0xff pattern:$0x75316420] }
  0x2e   :  { %v114_v30 = vld.sshfl [vmem:[#allocation1 + $0x10] sm:$0xff pattern:$0x75316420]  ;;  %v115_v31 = vld.sshfl [vmem:[#allocation1 + $0x18] sm:$0xff pattern:$0x75316420] }
  0x2f   :  { %v118_v32 = vld.sshfl [vmem:[#allocation1 + $0x20] sm:$0xff pattern:$0x75316420]  ;;  %v119_v33 = vld.sshfl [vmem:[#allocation1 + $0x28] sm:$0xff pattern:$0x75316420] }
  0x30   :  { %v122_v34 = vld.sshfl [vmem:[#allocation1 + $0x30] sm:$0xff pattern:$0x75316420]  ;;  %v123_v35 = vld.sshfl [vmem:[#allocation1 + $0x38] sm:$0xff pattern:$0x75316420] }
  0x31   :  { %124 = vst [vmem:[#allocation1] ss:$2 sm:$0xff] %v550_v5  ;;  %v153_v38 = vsel %vm152_vm0, %v110_v27, 0.0  ;;  %v154_v39 = vsel %vm152_vm0, %v118_v32, 0.0  ;;  %v160_v40 = vsel %vm152_vm0, %v111_v29, 0.0  ;;  %v161_v41 = vsel %vm152_vm0, %v119_v33, 0.0 }
  0x32   :  { %127 = vst [vmem:[#allocation1 + $0x10] ss:$2 sm:$0xff] %v552_v6  ;;  %v167_v42 = vsel %vm152_vm0, %v114_v30, 0.0  ;;  %v168_v43 = vsel %vm152_vm0, %v122_v34, 0.0  ;;  %v174_v44 = vsel %vm152_vm0, %v115_v31, 0.0  ;;  %v175_v45 = vsel %vm152_vm0, %v123_v35, 0.0 }
  0x33   :  { %130 = vst [vmem:[#allocation1 + $0x20] ss:$2 sm:$0xff] %v554_v8  ;;  %v155_v50 = vadd.f32 %v154_v39, %v153_v38  ;;  %v162_v51 = vadd.f32 %v161_v41, %v160_v40  ;;  %v169_v54 = vadd.f32 %v168_v43, %v167_v42  ;;  %v176_v57 = vadd.f32 %v175_v45, %v174_v44 }
  0x34   :  { %133 = vst [vmem:[#allocation1 + $0x30] ss:$2 sm:$0xff] %v556_v15 }
  0x38   :  { %v125_v46 = vld.sshfl [vmem:[#allocation1] sm:$0xff pattern:$0x75316420]  ;;  %v126_v47 = vld.sshfl [vmem:[#allocation1 + $0x8] sm:$0xff pattern:$0x75316420] }
  0x39   :  { %v128_v48 = vld.sshfl [vmem:[#allocation1 + $0x10] sm:$0xff pattern:$0x75316420]  ;;  %v129_v49 = vld.sshfl [vmem:[#allocation1 + $0x18] sm:$0xff pattern:$0x75316420] }
  0x3a   :  { %v131_v52 = vld.sshfl [vmem:[#allocation1 + $0x20] sm:$0xff pattern:$0x75316420]  ;;  %v132_v53 = vld.sshfl [vmem:[#allocation1 + $0x28] sm:$0xff pattern:$0x75316420] }
  0x3b   :  { %v134_v55 = vld.sshfl [vmem:[#allocation1 + $0x30] sm:$0xff pattern:$0x75316420]  ;;  %v135_v56 = vld.sshfl [vmem:[#allocation1 + $0x38] sm:$0xff pattern:$0x75316420] }
  0x3c   :  { %v156_v59 = vsel %vm152_vm0, %v125_v46, 0.0  ;;  %v158_v60 = vsel %vm152_vm0, %v131_v52, 0.0  ;;  %v163_v61 = vsel %vm152_vm0, %v126_v47, 0.0  ;;  %v165_v62 = vsel %vm152_vm0, %v132_v53, 0.0 }
  0x3d   :  { %v157_v63 = vadd.f32 %v156_v59, %v155_v50  ;;  %v164_v0 = vadd.f32 %v163_v61, %v162_v51  ;;  %v170_v7 = vsel %vm152_vm0, %v128_v48, 0.0  ;;  %v172_v9 = vsel %vm152_vm0, %v134_v55, 0.0 }
  0x3e   :  { %v171_v10 = vadd.f32 %v170_v7, %v169_v54  ;;  %v177_v11 = vsel %vm152_vm0, %v129_v49, 0.0  ;;  %v179_v12 = vsel %vm152_vm0, %v135_v56, 0.0 }
  0x3f   :  { %v159_v13 = vadd.f32 %v158_v60, %v157_v63  ;;  %v166_v14 = vadd.f32 %v165_v62, %v164_v0  ;;  %v178_v16 = vadd.f32 %v177_v11, %v176_v57 }
  0x40   :  { %v173_v17 = vadd.f32 %v172_v9, %v171_v10 }
  0x41   :  { %v180_v19 = vadd.f32 %v179_v12, %v178_v16  ;;  %v188_v20 = vmul.f32 %v635_v18, %v159_v13  ;;  %v189_v21 = vmul.f32 %v635_v18, %v166_v14 }
  0x42   :  { %v190_v22 = vmul.f32 %v635_v18, %v173_v17 }
  0x43   :  { %v191_v23 = vmul.f32 %v635_v18, %v180_v19  ;;  %v196_v24 = vrot.slane %v189_v21, 4 }
  0x45   :  { %v197_v25 = vrot.slane %v191_v23, 4  ;;  %v198_v27 = vsel %vm152_vm0, %v188_v20, %v196_v24 }
  0x46   :  { %v202_v28 = vsub.f32 %v538_v1, %v198_v27  ;;  %v204_v29 = vsub.f32 %v542_v3, %v198_v27  ;;  %v206_v36 = vsub.f32 %v550_v5, %v198_v27  ;;  %v208_v3 = vsub.f32 %v554_v8, %v198_v27 }
  0x47   :  { %v199_v26 = vsel %vm152_vm0, %v190_v22, %v197_v25 }
  0x48   :  { %v203_v30 = vsub.f32 %v540_v2, %v199_v26  ;;  %v205_v31 = vsub.f32 %v544_v4, %v199_v26  ;;  %v210_v32 = vmul.f32 %v202_v28, %v202_v28  ;;  %v212_v33 = vmul.f32 %v204_v29, %v204_v29 }
  0x49   :  { %v207_v1 = vsub.f32 %v552_v6, %v199_v26  ;;  %v209_v37 = vsub.f32 %v556_v15, %v199_v26  ;;  %v214_v38 = vmul.f32 %v206_v36, %v206_v36  ;;  %v216_v41 = vmul.f32 %v208_v3, %v208_v3 }
  0x4a   :  { %v211_v34 = vmul.f32 %v203_v30, %v203_v30  ;;  %v213_v35 = vmul.f32 %v205_v31, %v205_v31  ;;  %226 = vst [vmem:[#allocation1] ss:$2 sm:$0xff] %v210_v32 }
  0x4b   :  { %234 = vst [vmem:[#allocation1 + $0x20] ss:$2 sm:$0xff] %v212_v33  ;;  %v215_v39 = vmul.f32 %v207_v1, %v207_v1  ;;  %v217_v44 = vmul.f32 %v209_v37, %v209_v37 }
  0x4c   :  { %230 = vst [vmem:[#allocation1 + $0x10] ss:$2 sm:$0xff] %v211_v34  ;;  %v353_v34 = vlaneseq }
  0x4d   :  { %238 = vst [vmem:[#allocation1 + $0x30] ss:$2 sm:$0xff] %v213_v35 }
  0x51   :  { %v227_v2 = vld.sshfl [vmem:[#allocation1] sm:$0xff pattern:$0x75316420]  ;;  %v228_v4 = vld.sshfl [vmem:[#allocation1 + $0x8] sm:$0xff pattern:$0x75316420] }
  0x52   :  { %v235_v43 = vld.sshfl [vmem:[#allocation1 + $0x20] sm:$0xff pattern:$0x75316420]  ;;  %v236_v45 = vld.sshfl [vmem:[#allocation1 + $0x28] sm:$0xff pattern:$0x75316420] }
  0x53   :  { %v231_v40 = vld.sshfl [vmem:[#allocation1 + $0x10] sm:$0xff pattern:$0x75316420]  ;;  %v232_v42 = vld.sshfl [vmem:[#allocation1 + $0x18] sm:$0xff pattern:$0x75316420] }
  0x54   :  { %v239_v46 = vld.sshfl [vmem:[#allocation1 + $0x30] sm:$0xff pattern:$0x75316420]  ;;  %v240_v47 = vld.sshfl [vmem:[#allocation1 + $0x38] sm:$0xff pattern:$0x75316420] }
  0x55   :  { %241 = vst [vmem:[#allocation1] ss:$2 sm:$0xff] %v214_v38  ;;  %v269_v5 = vsel %vm152_vm0, %v227_v2, 0.0  ;;  %v270_v6 = vsel %vm152_vm0, %v235_v43, 0.0  ;;  %v276_v8 = vsel %vm152_vm0, %v228_v4, 0.0  ;;  %v277_v15 = vsel %vm152_vm0, %v236_v45, 0.0 }
  0x56   :  { %244 = vst [vmem:[#allocation1 + $0x10] ss:$2 sm:$0xff] %v215_v39  ;;  %v283_v48 = vsel %vm152_vm0, %v231_v40, 0.0  ;;  %v284_v49 = vsel %vm152_vm0, %v239_v46, 0.0  ;;  %v290_v50 = vsel %vm152_vm0, %v232_v42, 0.0  ;;  %v291_v51 = vsel %vm152_vm0, %v240_v47, 0.0 }
  0x57   :  { %247 = vst [vmem:[#allocation1 + $0x20] ss:$2 sm:$0xff] %v216_v41  ;;  %v271_v56 = vadd.f32 %v270_v6, %v269_v5  ;;  %v278_v57 = vadd.f32 %v277_v15, %v276_v8  ;;  %v285_v60 = vadd.f32 %v284_v49, %v283_v48  ;;  %v292_v63 = vadd.f32 %v291_v51, %v290_v50 }
  0x58   :  { %250 = vst [vmem:[#allocation1 + $0x30] ss:$2 sm:$0xff] %v217_v44 }
  0x5c   :  { %v242_v52 = vld.sshfl [vmem:[#allocation1] sm:$0xff pattern:$0x75316420]  ;;  %v243_v53 = vld.sshfl [vmem:[#allocation1 + $0x8] sm:$0xff pattern:$0x75316420] }
  0x5d   :  { %v245_v54 = vld.sshfl [vmem:[#allocation1 + $0x10] sm:$0xff pattern:$0x75316420]  ;;  %v246_v55 = vld.sshfl [vmem:[#allocation1 + $0x18] sm:$0xff pattern:$0x75316420] }
  0x5e   :  { %v248_v58 = vld.sshfl [vmem:[#allocation1 + $0x20] sm:$0xff pattern:$0x75316420]  ;;  %v249_v59 = vld.sshfl [vmem:[#allocation1 + $0x28] sm:$0xff pattern:$0x75316420] }
  0x5f   :  { %v251_v61 = vld.sshfl [vmem:[#allocation1 + $0x30] sm:$0xff pattern:$0x75316420]  ;;  %v252_v62 = vld.sshfl [vmem:[#allocation1 + $0x38] sm:$0xff pattern:$0x75316420] }
  0x60   :  { %v272_v0 = vsel %vm152_vm0, %v242_v52, 0.0  ;;  %v274_v7 = vsel %vm152_vm0, %v248_v58, 0.0  ;;  %v279_v9 = vsel %vm152_vm0, %v243_v53, 0.0  ;;  %v281_v10 = vsel %vm152_vm0, %v249_v59, 0.0 }
  0x61   :  { %v273_v11 = vadd.f32 %v272_v0, %v271_v56  ;;  %v280_v12 = vadd.f32 %v279_v9, %v278_v57  ;;  %v286_v13 = vsel %vm152_vm0, %v245_v54, 0.0  ;;  %v288_v14 = vsel %vm152_vm0, %v251_v61, 0.0 }
  0x62   :  { %v287_v16 = vadd.f32 %v286_v13, %v285_v60  ;;  %v293_v17 = vsel %vm152_vm0, %v246_v55, 0.0  ;;  %v295_v19 = vsel %vm152_vm0, %v252_v62, 0.0 }
  0x63   :  { %v275_v20 = vadd.f32 %v274_v7, %v273_v11  ;;  %v282_v21 = vadd.f32 %v281_v10, %v280_v12  ;;  %v294_v22 = vadd.f32 %v293_v17, %v292_v63 }
  0x64   :  { %v289_v23 = vadd.f32 %v288_v14, %v287_v16 }
  0x65   :  { %v296_v24 = vadd.f32 %v295_v19, %v294_v22  ;;  %v297_v25 = vmul.f32 %v275_v20, %v635_v18  ;;  %v298_v27 = vmul.f32 %v282_v21, %v635_v18 }
  0x66   :  { %v299_v28 = vmul.f32 %v289_v23, %v635_v18 }
  0x67   :  { %v300_v29 = vmul.f32 %v296_v24, %v635_v18  ;;  %v301_v26 = vadd.f32 0.0001, %v297_v25  ;;  %v302_v30 = vadd.f32 0.0001, %v298_v27  ;;  %v354_v18 = vshrl.u32 %v353_v34, 7 }
  0x68   :  { %v303_v31 = vadd.f32 0.0001, %v299_v28 }
  0x69   :  { %v304_v32 = vadd.f32 0.0001, %v300_v29  ;;  %486 = vrsqrt.f32 %v301_v26  ;;  %vm312_vm2 = vcmp.eq.f32.partialorder %v301_v26, inf  ;;  %vm357_vm3 = vcmp.lt.s32.totalorder %v354_v18, 4 }
  0x6a   :  { %488 = vrsqrt.f32 %v302_v30  ;;  %vm314_vm4 = vcmp.eq.f32.partialorder %v301_v26, 0.0  ;;  %v315_v6 = vand.u32 2147483648, %v301_v26  ;;  %vm324_vm5 = vcmp.eq.f32.partialorder %v302_v30, inf }
  0x6b   :  { %490 = vrsqrt.f32 %v303_v31  ;;  %vm326_vm6 = vcmp.eq.f32.partialorder %v302_v30, 0.0  ;;  %v327_v50 = vand.u32 2147483648, %v302_v30  ;;  %vm336_vm7 = vcmp.eq.f32.partialorder %v303_v31, inf }
  0x6c   :  { %492 = vrsqrt.f32 %v304_v32  ;;  %vm338_vm8 = vcmp.eq.f32.partialorder %v303_v31, 0.0  ;;  %v339_v53 = vand.u32 2147483648, %v303_v31  ;;  %vm348_vm9 = vcmp.eq.f32.partialorder %v304_v32, inf }
  0x6d   :  { %v351_v57 = vand.u32 2147483648, %v304_v32  ;;  %vm350_vm10 = vcmp.eq.f32.partialorder %v304_v32, 0.0 }
  0x6f   :  { %v487_v33 = vpop.eup %486 }
  0x70   :  { %v489_v35 = vpop.eup %488  ;;  %v306_v36 = vmul.f32 %v487_v33, %v301_v26 }
  0x71   :  { %v491_v1 = vpop.eup %490  ;;  %v318_v3 = vmul.f32 %v489_v35, %v302_v30 }
  0x72   :  { %v493_v37 = vpop.eup %492  ;;  %v307_v38 = vmul.f32 %v487_v33, %v306_v36  ;;  %v330_v2 = vmul.f32 %v491_v1, %v303_v31 }
  0x73   :  { %v319_v39 = vmul.f32 %v489_v35, %v318_v3  ;;  %v342_v4 = vmul.f32 %v493_v37, %v304_v32 }
  0x74   :  { %v308_v40 = vmul.f32 0.5, %v307_v38  ;;  %v331_v41 = vmul.f32 %v491_v1, %v330_v2 }
  0x75   :  { %v320_v42 = vmul.f32 0.5, %v319_v39  ;;  %v343_v43 = vmul.f32 %v493_v37, %v342_v4 }
  0x76   :  { %v309_v44 = vsub.f32 1.5, %v308_v40  ;;  %v332_v45 = vmul.f32 0.5, %v331_v41 }
  0x77   :  { %v321_v46 = vsub.f32 1.5, %v320_v42  ;;  %v344_v47 = vmul.f32 0.5, %v343_v43 }
  0x78   :  { %v310_v5 = vmul.f32 %v487_v33, %v309_v44  ;;  %v333_v8 = vsub.f32 1.5, %v332_v45  ;;  %v390_v45 = vld [vmem:[#allocation2] sm:$0xf] }
  0x79   :  { %v322_v15 = vmul.f32 %v489_v35, %v321_v46  ;;  %v345_v48 = vsub.f32 1.5, %v344_v47 }
  0x7a   :  { %v311_v49 = vmul.f32 %v310_v5, %v301_v26  ;;  %v334_v51 = vmul.f32 %v491_v1, %v333_v8 }
  0x7b   :  { %v323_v52 = vmul.f32 %v322_v15, %v302_v30  ;;  %v346_v54 = vmul.f32 %v493_v37, %v345_v48 }
  0x7c   :  { %v313_v55 = vsel %vm312_vm2, %v301_v26, %v311_v49  ;;  %v335_v56 = vmul.f32 %v334_v51, %v303_v31 }
  0x7d   :  { %v316_v58 = vsel %vm314_vm4, %v315_v6, %v313_v55  ;;  %v325_v59 = vsel %vm324_vm5, %v302_v30, %v323_v52  ;;  %v347_v60 = vmul.f32 %v346_v54, %v304_v32 }
  0x7e   :  { %v328_v61 = vsel %vm326_vm6, %v327_v50, %v325_v59  ;;  %v337_v62 = vsel %vm336_vm7, %v303_v31, %v335_v56  ;;  %v358_v63 = vsel %vm357_vm3, %v316_v58, 0.0 }
  0x7f   :  { %v340_v0 = vsel %vm338_vm8, %v339_v53, %v337_v62  ;;  %v349_v7 = vsel %vm348_vm9, %v304_v32, %v347_v60  ;;  %v359_v9 = vsel %vm357_vm3, %v328_v61, 0.0  ;;  %v362_v10 = vsel %vm152_vm0, %v358_v63, 0.0 }
  0x80   :  { %v352_v11 = vsel %vm350_vm10, %v351_v57, %v349_v7  ;;  %v360_v12 = vsel %vm357_vm3, %v340_v0, 0.0  ;;  %v363_v13 = vrot.slane %v362_v10, 4  ;;  %v369_v14 = vsel %vm152_vm0, %v359_v9, 0.0 }
  0x81   :  { %v361_v16 = vsel %vm357_vm3, %v352_v11, 0.0  ;;  %v370_v17 = vrot.slane %v369_v14, 4  ;;  %v376_v19 = vsel %vm152_vm0, %v360_v12, 0.0 }
  0x82   :  { %v364_v20 = vadd.f32 %v363_v13, %v362_v10  ;;  %v377_v21 = vrot.slane %v376_v19, 4  ;;  %v383_v22 = vsel %vm152_vm0, %v361_v16, 0.0  ;;  %vm440_vm0 = vcmp.lt.s32.totalorder %v353_v34, 256 }
  0x83   :  { %v371_v23 = vadd.f32 %v370_v17, %v369_v14  ;;  %v384_v24 = vrot.slane %v383_v22, 4 }
  0x84   :  { %v365_v25 = vrot.slane %v364_v20, 2  ;;  %v378_v27 = vadd.f32 %v377_v21, %v376_v19 }
  0x85   :  { %v372_v28 = vrot.slane %v371_v23, 2  ;;  %v385_v29 = vadd.f32 %v384_v24, %v383_v22 }
  0x86   :  { %v366_v26 = vadd.f32 %v365_v25, %v364_v20  ;;  %v379_v30 = vrot.slane %v378_v27, 2 }
  0x87   :  { %v373_v31 = vadd.f32 %v372_v28, %v371_v23  ;;  %v386_v32 = vrot.slane %v385_v29, 2 }
  0x88   :  { %v380_v33 = vadd.f32 %v379_v30, %v378_v27  ;;  %v367_v35 = vrot.slane %v366_v26, 1 }
  0x89   :  { %v374_v36 = vrot.slane %v373_v31, 1  ;;  %v387_v1 = vadd.f32 %v386_v32, %v385_v29 }
  0x8a   :  { %v381_v3 = vrot.slane %v380_v33, 1  ;;  %v368_v2 = vadd.f32 %v367_v35, %v366_v26 }
  0x8b   :  { %v375_v37 = vadd.f32 %v374_v36, %v373_v31  ;;  %v388_v38 = vrot.slane %v387_v1, 1 }
  0x8c   :  { %v382_v39 = vadd.f32 %v381_v3, %v380_v33 }
  0x8d   :  { %v389_v4 = vadd.f32 %v388_v38, %v387_v1  ;;  %v395_v18 = vrot.slane %v375_v37, 6 }
  0x8f   :  { %v396_v40 = vrot.slane %v389_v4, 6  ;;  %v398_v41 = vsel %vm397_vm11, %v368_v2, %v395_v18 }
  0x91   :  { %v399_v42 = vsel %vm397_vm11, %v382_v39, %v396_v40 }
  0x92   :  { %v404_v43 = vrot.slane %v399_v42, 7 }
  0x94   :  { %v406_v44 = vsel %vm405_vm12, %v404_v43, %v398_v41 }
  0x95   :  { %v408_v46 = vsel %vm407_vm13, %v404_v43, %v406_v44 }
  0x96   :  { %v410_v47 = vsel %vm409_vm14, %v404_v43, %v408_v46 }
  0x97   :  { %v412_v5 = vsel %vm411_vm15, %v404_v43, %v410_v47 }
  0x98   :  { %v414_v6 = vadd.f32 %v412_v5, %v390_v45 }
  0x9a   :  { %415 = vst [vmem:[#allocation2] sm:$0xf] %v414_v6 }
  0xa1   :  { %v419_v8 = vld [vmem:[#allocation2] sm:$0xf] }
  0xa2   :  { %421 = vst [vmem:[#allocation1] ss:$4 sm:$0xff] %v419_v8 }
  0xa9   :  { %v422_v15 = vld.sshfl [vmem:[#allocation1] sm:$0xff pattern:$0x73625140]  ;;  %v423_v48 = vld.sshfl [vmem:[#allocation1 + $0x8] sm:$0xff pattern:$0x73625140] }
  0xaa   :  { %v427_v49 = vsel %vm397_vm11, %v422_v15, 0.0  ;;  %v428_v50 = vsel %vm397_vm11, %v423_v48, 0.0 }
  0xab   :  { %v429_v51 = vadd.f32 %v428_v50, %v427_v49 }
  0xad   :  { %430 = vadd.xlane.f32.xlu0 %v429_v51 }
 0x120   :  { %v431_v52 = vpop.xlane.xlu0 %430 }
 0x121   :  { %v432_v53 = vmul.f32 0.0009765625, %v431_v52 }
 0x123   :  { %v434_v54 = vperm.slane %v432_v53, 0  ;;  %v435_v55 = vperm.slane %v432_v53, 1 }
 0x125   :  { %471 = vst.msk [vmem:[%s714_s1 + $0x4] ss:$8 sm:$0x3] %vm440_vm0, %v434_v54 }
 0x126   :  { %472 = vst.msk [vmem:[%s714_s1 + $0x14] ss:$8 sm:$0x3] %vm440_vm0, %v435_v55 }
 0x127   :  { %473 = vst.msk [vmem:[%s714_s1 + $0x24] ss:$8 sm:$0x3] %vm440_vm0, %v434_v54 }
 0x128   :  { %474 = vst.msk [vmem:[%s714_s1 + $0x34] ss:$8 sm:$0x3] %vm440_vm0, %v435_v55 }
 0x129   :  { %475 = vst.msk [vmem:[%s714_s1 + $0x44] ss:$8 sm:$0x3] %vm440_vm0, %v434_v54 }
 0x12a   :  { %476 = vst.msk [vmem:[%s714_s1 + $0x54] ss:$8 sm:$0x3] %vm440_vm0, %v435_v55 }
 0x12b   :  { %477 = vst.msk [vmem:[%s714_s1 + $0x64] ss:$8 sm:$0x3] %vm440_vm0, %v434_v54 }
 0x12c   :  { %478 = vst.msk [vmem:[%s714_s1 + $0x74] ss:$8 sm:$0x3] %vm440_vm0, %v435_v55 }
 0x12d   :  { %470 = vsyncpa [#allocation4], 1 }

</bundles_post_ra>
